<compile_context>
chip_gen: v7x
topology: tpu7x:2x2x1
jax: 0.10.0
libtpu: 0.0.40
codegen_flags: <defaults>
</compile_context>

<pallas_src>
import functools

import jax
import jax.numpy as jnp
import numpy as np
from jax.experimental import pallas as pl
from jax.experimental.pallas import tpu as pltpu

LANE = 128  # lane width; gates / vocab are padded to multiples of this


# ----------------------------------------------------------------------------
# Kernel
# ----------------------------------------------------------------------------
def rnn_forward_kernel(idx_ref, emb_ref, w1_ref, b1_ref, w2_ref, b2_ref,
                       wfc_ref, bfc_ref, out_ref, *, v_actual):
    tn = idx_ref.shape[0]               # rows in this tile
    vocab = emb_ref.shape[0]            # actual vocab rows in the table
    v_pad = out_ref.shape[1]            # lane-padded vocab (multiple of 128)
    hp = w1_ref.shape[1] // 3           # lane-padded per-gate width

    # ---- embedding lookup: one-hot (bf16) @ table (bf16) on the MXU ---------
    # (out-of-range indices produce an all-zero one-hot row -> zero embedding)
    idx = idx_ref[...]                                          # (tn, 1) int32
    vocab_iota = jax.lax.broadcasted_iota(jnp.int32, (tn, vocab), 1)
    one_hot = (vocab_iota == idx).astype(jnp.bfloat16)
    x = jnp.dot(one_hot, emb_ref[...],
                preferred_element_type=jnp.float32).astype(jnp.bfloat16)

    def lstm_single_step(x_bf, w_ref, b_ref):
        # Gates packed lane-aligned as [ i | g | o ], each padded to hp lanes.
        # Forget gate dropped entirely: f * c0 == 0 because c0 == 0.
        g = jnp.dot(x_bf, w_ref[...],
                    preferred_element_type=jnp.float32) + b_ref[...]
        i_g = jax.nn.sigmoid(g[:, 0 * hp:1 * hp])
        c_g = jnp.tanh(g[:, 1 * hp:2 * hp])
        o_g = jax.nn.sigmoid(g[:, 2 * hp:3 * hp])
        c = i_g * c_g
        return o_g * jnp.tanh(c)        # padding lanes come out exactly 0

    # ---- 2-layer LSTM, single step each, h0 = c0 = 0 -------------------------
    h1 = lstm_single_step(x, w1_ref, b1_ref)
    h2 = lstm_single_step(h1.astype(jnp.bfloat16), w2_ref, b2_ref)

    # ---- fc -> ReLU -> LogSoftmax(dim=1) --------------------------------------
    logits = jnp.dot(h2.astype(jnp.bfloat16), wfc_ref[...],
                     preferred_element_type=jnp.float32) + bfc_ref[...]
    z = jnp.maximum(logits, 0.0)
    if v_actual < v_pad:                # compile-time branch: mask padded vocab
        col = jax.lax.broadcasted_iota(jnp.int32, (tn, v_pad), 1)
        z = jnp.where(col < v_actual, z, -1e30)
    m = jnp.max(z, axis=1, keepdims=True)
    lse = jnp.log(jnp.sum(jnp.exp(z - m), axis=1, keepdims=True)) + m
    out_ref[...] = z - lse


# ----------------------------------------------------------------------------
# Wrapper
# ----------------------------------------------------------------------------
def rnn_model_forward(sentence, emb_table_bf16, packed, *, max_tile_rows=256):
    """sentence: int32 [N] word indices. Returns log-probs [N, V] (is_test=False)."""
    w1p, b1p, w2p, b2p, wfcp, bfcp = packed
    n = int(sentence.shape[0])
    v_actual, d = emb_table_bf16.shape
    v_pad = wfcp.shape[1]
    hp3 = w1p.shape[1]

    # Row tile: whole (padded) sentence at demo size, capped at 256 rows to
    # fill the 256-wide MXU on v6e/v7x while staying comfortably inside VMEM.
    tn = min(max_tile_rows, ((n + 7) // 8) * 8)
    num_tiles = pl.cdiv(n, tn)
    n_pad = num_tiles * tn

    idx = jnp.zeros((n_pad, 1), jnp.int32).at[:n, 0].set(
        sentence.astype(jnp.int32))

    kernel = functools.partial(rnn_forward_kernel, v_actual=v_actual)

    out = pl.pallas_call(
        kernel,
        out_shape=jax.ShapeDtypeStruct((n_pad, v_pad), jnp.float32),
        grid_spec=pltpu.PrefetchScalarGridSpec(
            num_scalar_prefetch=0,
            grid=(num_tiles,),
            in_specs=[
                # word indices: tiled by row
                pl.BlockSpec((tn, 1), lambda i: (i, 0)),
                # embedding table + all weights: pinned VMEM-resident
                pl.BlockSpec((v_actual, d), lambda i: (0, 0)),
                pl.BlockSpec((w1p.shape[0], hp3), lambda i: (0, 0)),
                pl.BlockSpec((1, hp3), lambda i: (0, 0)),
                pl.BlockSpec((w2p.shape[0], hp3), lambda i: (0, 0)),
                pl.BlockSpec((1, hp3), lambda i: (0, 0)),
                pl.BlockSpec((wfcp.shape[0], v_pad), lambda i: (0, 0)),
                pl.BlockSpec((1, v_pad), lambda i: (0, 0)),
            ],
            out_specs=pl.BlockSpec((tn, v_pad), lambda i: (i, 0)),
        ),
        compiler_params=pltpu.CompilerParams(
            dimension_semantics=("parallel",)),   # row tiles split across TCs (v7x)
    )(idx, emb_table_bf16, w1p, b1p, w2p, b2p, wfcp, bfcp)

    return out[:n, :v_actual]


# ----------------------------------------------------------------------------
# Parameter construction (torch layout) and packing for the kernel
# ----------------------------------------------------------------------------
def init_torch_params(key, vocab_len, embedding_dim, hidden):
    """Synthetic params with the PyTorch module's shapes/init."""
    D, H, V = embedding_dim, hidden, vocab_len
    ks = jax.random.split(key, 10)
    bound = 1.0 / np.sqrt(H)                 # PyTorch default LSTM init

    def u(k, shape):
        return jax.random.uniform(k, shape, jnp.float32, -bound, bound)

    params = dict(
        w_ih0=u(ks[0], (4 * H, D)), w_hh0=u(ks[1], (4 * H, H)),
        b_ih0=u(ks[2], (4 * H,)),   b_hh0=u(ks[3], (4 * H,)),
        w_ih1=u(ks[4], (4 * H, H)), w_hh1=u(ks[5], (4 * H, H)),
        b_ih1=u(ks[6], (4 * H,)),   b_hh1=u(ks[7], (4 * H,)),
    )
    fc_bound = np.sqrt(6.0 / (H + V))        # weights_init for nn.Linear
    params["w_fc"] = jax.random.uniform(ks[8], (V, H), jnp.float32,
                                        -fc_bound, fc_bound)
    params["b_fc"] = jnp.zeros((V,), jnp.float32)   # weights_init: bias = 0
    params["emb"] = jax.random.normal(ks[9], (V, D), jnp.float32)
    return params


def pack_params(p, hidden):
    """Pack torch-layout weights for the kernel:
       - drop the forget gate (gate order i, g, o),
       - pre-transpose, fold b_ih + b_hh,
       - pad each gate to hp = ceil(H/128)*128 lanes (layer-2/fc input rows
         padded to hp, vocab padded to a multiple of 128),
       - cast matmul weights to bf16 (biases stay f32)."""
    H = hidden
    hp = ((H + LANE - 1) // LANE) * LANE
    keep = (0, 2, 3)   # torch gate row-blocks i, g, o (f dropped: f*c0 == 0)

    def pack_lstm(w_ih, b_ih, b_hh, in_pad):
        w_ih = np.asarray(w_ih, np.float32)
        b_sum = np.asarray(b_ih, np.float32) + np.asarray(b_hh, np.float32)
        in_dim = w_ih.shape[1]
        w = np.zeros((in_pad, 3 * hp), np.float32)
        b = np.zeros((1, 3 * hp), np.float32)
        for slot, g in enumerate(keep):
            w[:in_dim, slot * hp:slot * hp + H] = w_ih[g * H:(g + 1) * H, :].T
            b[0, slot * hp:slot * hp + H] = b_sum[g * H:(g + 1) * H]
        return jnp.asarray(w, jnp.bfloat16), jnp.asarray(b, jnp.float32)

    D = np.asarray(p["w_ih0"]).shape[1]
    w1p, b1p = pack_lstm(p["w_ih0"], p["b_ih0"], p["b_hh0"], in_pad=D)
    w2p, b2p = pack_lstm(p["w_ih1"], p["b_ih1"], p["b_hh1"], in_pad=hp)

    w_fc = np.asarray(p["w_fc"], np.float32)             # (V, H)
    V = w_fc.shape[0]
    v_pad = ((V + LANE - 1) // LANE) * LANE
    wfc = np.zeros((hp, v_pad), np.float32)
    wfc[:H, :V] = w_fc.T
    bfc = np.zeros((1, v_pad), np.float32)
    bfc[0, :V] = np.asarray(p["b_fc"], np.float32)
    return (w1p, b1p, w2p, b2p,
            jnp.asarray(wfc, jnp.bfloat16), jnp.asarray(bfc, jnp.float32))


# ----------------------------------------------------------------------------
# Pure-JAX reference (f32, torch layout) for the sanity check
# ----------------------------------------------------------------------------
def reference_forward(sentence, p, hidden):
    H = hidden
    x = p["emb"][sentence]

    def step(x, w_ih, b_ih, b_hh):
        g = x @ w_ih.T + b_ih + b_hh        # h0 @ w_hh.T term is 0 (h0 = 0)
        i = jax.nn.sigmoid(g[:, 0 * H:1 * H])
        gc = jnp.tanh(g[:, 2 * H:3 * H])
        o = jax.nn.sigmoid(g[:, 3 * H:4 * H])
        c = i * gc                          # + f * c0 with c0 = 0
        return o * jnp.tanh(c)

    h1 = step(x, p["w_ih0"], p["b_ih0"], p["b_hh0"])
    h2 = step(h1, p["w_ih1"], p["b_ih1"], p["b_hh1"])
    z = jnp.maximum(h2 @ p["w_fc"].T + p["b_fc"], 0.0)
    return jax.nn.log_softmax(z, axis=1)


if __name__ == "__main__":
    # Small shapes consistent with the module: seq=8 words, emb=32, hidden=32, vocab=128
    SEQ, D, H, V = 8, 32, 32, 128
    key = jax.random.PRNGKey(0)
    k_params, k_sent = jax.random.split(key)

    params = init_torch_params(k_params, vocab_len=V, embedding_dim=D, hidden=H)
    packed = pack_params(params, H)
    sentence = jax.random.randint(k_sent, (SEQ,), 0, V, dtype=jnp.int32)
    emb_bf16 = params["emb"].astype(jnp.bfloat16)   # table lives in VMEM as bf16

    out = rnn_model_forward(sentence, emb_bf16, packed)   # [SEQ, V] log-probs
    out = jax.block_until_ready(out)

    ref = reference_forward(sentence, params, H)
    # bf16 table / matmul weights -> loosened tolerance (math path is f32)
    np.testing.assert_allclose(np.asarray(out), np.asarray(ref),
                               atol=2e-2, rtol=2e-2)

    print("KERNEL_OK")
</pallas_src>

<mosaic_0001>
module attributes {stable_mosaic.version = 11 : i64} {
  func.func @rnn_forward_kernel(%arg0: i32, %arg1: memref<8x1xi32, #tpu.memory_space<vmem>>, %arg2: memref<128x32xbf16, #tpu.memory_space<vmem>>, %arg3: memref<32x384xbf16, #tpu.memory_space<vmem>>, %arg4: memref<1x384xf32, #tpu.memory_space<vmem>>, %arg5: memref<128x384xbf16, #tpu.memory_space<vmem>>, %arg6: memref<1x384xf32, #tpu.memory_space<vmem>>, %arg7: memref<128x128xbf16, #tpu.memory_space<vmem>>, %arg8: memref<1x128xf32, #tpu.memory_space<vmem>>, %arg9: memref<8x128xf32, #tpu.memory_space<vmem>>) attributes {dimension_semantics = [#tpu.dimension_semantics<parallel>], iteration_bounds = array<i64: 1>, scalar_prefetch = 0 : i64, scratch_operands = 0 : i64, tpu.core_type = #tpu.core_type<tc>, window_params = [{transform_indices = @transform_0, window_bounds = array<i64: 8, 1>}, {pipeline_mode = #tpu.pipeline_mode<synchronous>, transform_indices = @transform_1, window_bounds = array<i64: 128, 32>}, {pipeline_mode = #tpu.pipeline_mode<synchronous>, transform_indices = @transform_2, window_bounds = array<i64: 32, 384>}, {pipeline_mode = #tpu.pipeline_mode<synchronous>, transform_indices = @transform_3, window_bounds = array<i64: 1, 384>}, {pipeline_mode = #tpu.pipeline_mode<synchronous>, transform_indices = @transform_4, window_bounds = array<i64: 128, 384>}, {pipeline_mode = #tpu.pipeline_mode<synchronous>, transform_indices = @transform_5, window_bounds = array<i64: 1, 384>}, {pipeline_mode = #tpu.pipeline_mode<synchronous>, transform_indices = @transform_6, window_bounds = array<i64: 128, 128>}, {pipeline_mode = #tpu.pipeline_mode<synchronous>, transform_indices = @transform_7, window_bounds = array<i64: 1, 128>}, {transform_indices = @transform_8, window_bounds = array<i64: 8, 128>}]} {
    %c0 = arith.constant 0 : index
    %c0_0 = arith.constant 0 : index
    %0 = vector.load %arg1[%c0, %c0_0] : memref<8x1xi32, #tpu.memory_space<vmem>>, vector<8x1xi32>
    %1 = tpu.iota {dimensions = array<i32: 1>} : vector<8x128xi32>
    %2 = vector.broadcast %0 : vector<8x1xi32> to vector<8x128xi32>
    %3 = arith.cmpi eq, %1, %2 : vector<8x128xi32>
    %4 = arith.extui %3 : vector<8x128xi1> to vector<8x128xi32>
    %5 = arith.sitofp %4 : vector<8x128xi32> to vector<8x128xf32>
    %6 = arith.truncf %5 : vector<8x128xf32> to vector<8x128xbf16>
    %c0_1 = arith.constant 0 : index
    %c0_2 = arith.constant 0 : index
    %7 = vector.load %arg2[%c0_1, %c0_2] : memref<128x32xbf16, #tpu.memory_space<vmem>>, vector<128x32xbf16>
    %cst = arith.constant dense<0.000000e+00> : vector<8x32xf32>
    %8 = tpu.matmul %6, %7, %cst {dimension_numbers = #tpu.dot_dimension_numbers<[1], [0], [0], [1], [0, 0, 1, 1], [], []>} : vector<8x128xbf16>, vector<128x32xbf16>, vector<8x32xf32> -> vector<8x32xf32>
    %9 = arith.truncf %8 : vector<8x32xf32> to vector<8x32xbf16>
    %c0_3 = arith.constant 0 : index
    %c0_4 = arith.constant 0 : index
    %10 = vector.load %arg3[%c0_3, %c0_4] : memref<32x384xbf16, #tpu.memory_space<vmem>>, vector<32x384xbf16>
    %cst_5 = arith.constant dense<0.000000e+00> : vector<8x384xf32>
    %11 = tpu.matmul %9, %10, %cst_5 {dimension_numbers = #tpu.dot_dimension_numbers<[1], [0], [0], [1], [0, 0, 1, 1], [], []>} : vector<8x32xbf16>, vector<32x384xbf16>, vector<8x384xf32> -> vector<8x384xf32>
    %c0_6 = arith.constant 0 : index
    %c0_7 = arith.constant 0 : index
    %12 = vector.load %arg4[%c0_6, %c0_7] : memref<1x384xf32, #tpu.memory_space<vmem>>, vector<1x384xf32>
    %13 = vector.broadcast %12 : vector<1x384xf32> to vector<8x384xf32>
    %14 = arith.addf %11, %13 : vector<8x384xf32>
    %15 = vector.extract_strided_slice %14 {offsets = [0, 0], sizes = [8, 128], strides = [1, 1]} : vector<8x384xf32> to vector<8x128xf32>
    %16 = arith.negf %15 : vector<8x128xf32>
    %17 = math.exp %16 : vector<8x128xf32>
    %cst_8 = arith.constant 1.000000e+00 : f32
    %18 = vector.broadcast %cst_8 : f32 to vector<8x128xf32>
    %19 = arith.addf %18, %17 : vector<8x128xf32>
    %20 = arith.divf %18, %19 : vector<8x128xf32>
    %21 = vector.extract_strided_slice %14 {offsets = [0, 128], sizes = [8, 128], strides = [1, 1]} : vector<8x384xf32> to vector<8x128xf32>
    %22 = math.tanh %21 : vector<8x128xf32>
    %23 = vector.extract_strided_slice %14 {offsets = [0, 256], sizes = [8, 128], strides = [1, 1]} : vector<8x384xf32> to vector<8x128xf32>
    %24 = arith.negf %23 : vector<8x128xf32>
    %25 = math.exp %24 : vector<8x128xf32>
    %cst_9 = arith.constant 1.000000e+00 : f32
    %26 = vector.broadcast %cst_9 : f32 to vector<8x128xf32>
    %27 = arith.addf %26, %25 : vector<8x128xf32>
    %28 = arith.divf %26, %27 : vector<8x128xf32>
    %29 = arith.mulf %20, %22 : vector<8x128xf32>
    %30 = math.tanh %29 : vector<8x128xf32>
    %31 = arith.mulf %28, %30 : vector<8x128xf32>
    %32 = arith.truncf %31 : vector<8x128xf32> to vector<8x128xbf16>
    %c0_10 = arith.constant 0 : index
    %c0_11 = arith.constant 0 : index
    %33 = vector.load %arg5[%c0_10, %c0_11] : memref<128x384xbf16, #tpu.memory_space<vmem>>, vector<128x384xbf16>
    %cst_12 = arith.constant dense<0.000000e+00> : vector<8x384xf32>
    %34 = tpu.matmul %32, %33, %cst_12 {dimension_numbers = #tpu.dot_dimension_numbers<[1], [0], [0], [1], [0, 0, 1, 1], [], []>} : vector<8x128xbf16>, vector<128x384xbf16>, vector<8x384xf32> -> vector<8x384xf32>
    %c0_13 = arith.constant 0 : index
    %c0_14 = arith.constant 0 : index
    %35 = vector.load %arg6[%c0_13, %c0_14] : memref<1x384xf32, #tpu.memory_space<vmem>>, vector<1x384xf32>
    %36 = vector.broadcast %35 : vector<1x384xf32> to vector<8x384xf32>
    %37 = arith.addf %34, %36 : vector<8x384xf32>
    %38 = vector.extract_strided_slice %37 {offsets = [0, 0], sizes = [8, 128], strides = [1, 1]} : vector<8x384xf32> to vector<8x128xf32>
    %39 = arith.negf %38 : vector<8x128xf32>
    %40 = math.exp %39 : vector<8x128xf32>
    %cst_15 = arith.constant 1.000000e+00 : f32
    %41 = vector.broadcast %cst_15 : f32 to vector<8x128xf32>
    %42 = arith.addf %41, %40 : vector<8x128xf32>
    %43 = arith.divf %41, %42 : vector<8x128xf32>
    %44 = vector.extract_strided_slice %37 {offsets = [0, 128], sizes = [8, 128], strides = [1, 1]} : vector<8x384xf32> to vector<8x128xf32>
    %45 = math.tanh %44 : vector<8x128xf32>
    %46 = vector.extract_strided_slice %37 {offsets = [0, 256], sizes = [8, 128], strides = [1, 1]} : vector<8x384xf32> to vector<8x128xf32>
    %47 = arith.negf %46 : vector<8x128xf32>
    %48 = math.exp %47 : vector<8x128xf32>
    %cst_16 = arith.constant 1.000000e+00 : f32
    %49 = vector.broadcast %cst_16 : f32 to vector<8x128xf32>
    %50 = arith.addf %49, %48 : vector<8x128xf32>
    %51 = arith.divf %49, %50 : vector<8x128xf32>
    %52 = arith.mulf %43, %45 : vector<8x128xf32>
    %53 = math.tanh %52 : vector<8x128xf32>
    %54 = arith.mulf %51, %53 : vector<8x128xf32>
    %55 = arith.truncf %54 : vector<8x128xf32> to vector<8x128xbf16>
    %c0_17 = arith.constant 0 : index
    %c0_18 = arith.constant 0 : index
    %56 = vector.load %arg7[%c0_17, %c0_18] : memref<128x128xbf16, #tpu.memory_space<vmem>>, vector<128x128xbf16>
    %cst_19 = arith.constant dense<0.000000e+00> : vector<8x128xf32>
    %57 = tpu.matmul %55, %56, %cst_19 {dimension_numbers = #tpu.dot_dimension_numbers<[1], [0], [0], [1], [0, 0, 1, 1], [], []>} : vector<8x128xbf16>, vector<128x128xbf16>, vector<8x128xf32> -> vector<8x128xf32>
    %c0_20 = arith.constant 0 : index
    %c0_21 = arith.constant 0 : index
    %58 = vector.load %arg8[%c0_20, %c0_21] : memref<1x128xf32, #tpu.memory_space<vmem>>, vector<1x128xf32>
    %59 = vector.broadcast %58 : vector<1x128xf32> to vector<8x128xf32>
    %60 = arith.addf %57, %59 : vector<8x128xf32>
    %cst_22 = arith.constant 0.000000e+00 : f32
    %61 = vector.broadcast %cst_22 : f32 to vector<8x128xf32>
    %62 = arith.maximumf %60, %61 : vector<8x128xf32>
    %cst_23 = arith.constant dense<0xFF800000> : vector<8xf32>
    %63 = vector.multi_reduction <maximumf>, %62, %cst_23 [1] : vector<8x128xf32> to vector<8xf32>
    %64 = vector.shape_cast %63 : vector<8xf32> to vector<8x1xf32>
    %65 = vector.broadcast %64 : vector<8x1xf32> to vector<8x128xf32>
    %66 = arith.subf %62, %65 : vector<8x128xf32>
    %67 = math.exp %66 : vector<8x128xf32>
    %cst_24 = arith.constant dense<0.000000e+00> : vector<8xf32>
    %68 = vector.multi_reduction <add>, %67, %cst_24 [1] : vector<8x128xf32> to vector<8xf32>
    %69 = vector.shape_cast %68 : vector<8xf32> to vector<8x1xf32>
    %70 = math.log %69 : vector<8x1xf32>
    %71 = arith.addf %70, %64 : vector<8x1xf32>
    %72 = vector.broadcast %71 : vector<8x1xf32> to vector<8x128xf32>
    %73 = arith.subf %62, %72 : vector<8x128xf32>
    %c0_25 = arith.constant 0 : index
    %c0_26 = arith.constant 0 : index
    %74 = vector.load %arg9[%c0_25, %c0_26] : memref<8x128xf32, #tpu.memory_space<vmem>>, vector<8x128xf32>
    tpu.vector_store %arg9[%c0_25, %c0_26], %73 {strides = array<i32>} : memref<8x128xf32, #tpu.memory_space<vmem>>, vector<8x128xf32>,
    return
  }
  func.func @transform_0(%arg0: i32) -> (i32, i32) {
    %c0_i32 = arith.constant 0 : i32
    %c0_i32_0 = arith.constant 0 : i32
    return %arg0, %c0_i32 : i32, i32
  }
  func.func @transform_1(%arg0: i32) -> (i32, i32) {
    %c0_i32 = arith.constant 0 : i32
    %c0_i32_0 = arith.constant 0 : i32
    %c0_i32_1 = arith.constant 0 : i32
    return %c0_i32, %c0_i32_0 : i32, i32
  }
  func.func @transform_2(%arg0: i32) -> (i32, i32) {
    %c0_i32 = arith.constant 0 : i32
    %c0_i32_0 = arith.constant 0 : i32
    %c0_i32_1 = arith.constant 0 : i32
    return %c0_i32, %c0_i32_0 : i32, i32
  }
  func.func @transform_3(%arg0: i32) -> (i32, i32) {
    %c0_i32 = arith.constant 0 : i32
    %c0_i32_0 = arith.constant 0 : i32
    %c0_i32_1 = arith.constant 0 : i32
    return %c0_i32, %c0_i32_0 : i32, i32
  }
  func.func @transform_4(%arg0: i32) -> (i32, i32) {
    %c0_i32 = arith.constant 0 : i32
    %c0_i32_0 = arith.constant 0 : i32
    %c0_i32_1 = arith.constant 0 : i32
    return %c0_i32, %c0_i32_0 : i32, i32
  }
  func.func @transform_5(%arg0: i32) -> (i32, i32) {
    %c0_i32 = arith.constant 0 : i32
    %c0_i32_0 = arith.constant 0 : i32
    %c0_i32_1 = arith.constant 0 : i32
    return %c0_i32, %c0_i32_0 : i32, i32
  }
  func.func @transform_6(%arg0: i32) -> (i32, i32) {
    %c0_i32 = arith.constant 0 : i32
    %c0_i32_0 = arith.constant 0 : i32
    %c0_i32_1 = arith.constant 0 : i32
    return %c0_i32, %c0_i32_0 : i32, i32
  }
  func.func @transform_7(%arg0: i32) -> (i32, i32) {
    %c0_i32 = arith.constant 0 : i32
    %c0_i32_0 = arith.constant 0 : i32
    %c0_i32_1 = arith.constant 0 : i32
    return %c0_i32, %c0_i32_0 : i32, i32
  }
  func.func @transform_8(%arg0: i32) -> (i32, i32) {
    %c0_i32 = arith.constant 0 : i32
    %c0_i32_0 = arith.constant 0 : i32
    return %arg0, %c0_i32 : i32, i32
  }
}

</mosaic_0001>

<bundles_post_ra>
// kernel: tpu_custom_call.1
= control target key start
LH: loop header
LB: loop body
LE: loop exit
PB: predicated region body
PF: predicated region fallthrough
CT: control target
= control target key end

     0   :  { %13 = vsyncpa [#allocation3], 0  ;;  %s1270_s0 = inlined_call_operand.vmem [shape: s32[8,1], index: 0, kind: input, shape index: {}]   ;;  %s1271_s1 = inlined_call_operand.vmem [shape: bf16[128,32], index: 1, kind: input, shape index: {}]   ;;  %s1272_s2 = inlined_call_operand.hbm [shape: bf16[32,384], index: 2, kind: input, shape index: {}]   ;;  %s1273_s3 = inlined_call_operand.vmem [shape: f32[1,384], index: 3, kind: input, shape index: {}]   ;;  %s1274_s4 = inlined_call_operand.hbm [shape: bf16[128,384], index: 4, kind: input, shape index: {}]   ;;  %s1275_s5 = inlined_call_operand.vmem [shape: f32[1,384], index: 5, kind: input, shape index: {}]   ;;  %s1276_s6 = inlined_call_operand.vmem [shape: bf16[128,128], index: 6, kind: input, shape index: {}]   ;;  %s1277_s7 = inlined_call_operand.vmem [shape: f32[1,128], index: 7, kind: input, shape index: {}]   ;;  %s1278_s8 = inlined_call_operand.hbm [shape: f32[8,128], index: 8, kind: output, shape index: {}]  }
   0x1   :  { %14 = vsyncpa [#allocation6], 0 }
   0x2   :  { %15 = vsyncpa [#allocation4], 0  ;;  %s1068_s27 = smov [#allocation2]   ;;  %s996_s9 = scalar_lea.hbm %s1272_s2, 768 }
   0x3   :  { %s25_s28 = sshll.u32 %s1068_s27, 4  ;;  %p997_p0 = scmp.ne.s32.totalorder %s1272_s2, %s996_s9  ;;  %s26_s28 = int_to_ptr.vmem [resolvable:$true] %s25_s28 }
   0x4   :  { %p1000_p1 = scmp.lt.u32.totalorder %s996_s9, %s1272_s2 }
   0x6   :  { %p1002_p2 = pnand %p1000_p1, %p997_p0 }
   0x8   :  { %1005 = shalt.err (!%p1002_p2)
}
   0x9   :  { %s1006_s14 = scalar_lea.vmem %s26_s28, 768  ;;  %p1011_p4 = scmp.lt.s32.totalorder %s26_s28, %s26_s28 }
   0xa   :  { %p1007_p3 = scmp.ne.s32.totalorder %s26_s28, %s1006_s14  ;;  %p1012_p5 = scmp.lt.s32.totalorder %s1006_s14, %s1006_s14 }
   0xc   :  { %p1013_p6 = por %p1012_p5, %p1011_p4 }
   0xe   :  { %p1014_p7 = pnand %p1013_p6, %p1007_p3 }
  0x10   :  { %1017 = shalt.err (!%p1014_p7)
}
  0x11   :  { %s1069_s15 = smov 192   ;;  %s1070_s16 = smov 12  }
  0x12   :  { %31 = dma.hbm_to_vmem [thread:$0]  %s1272_s2, 768, %s26_s28, [#allocation3], %s1069_s15, %s1069_s15, %s1070_s16  }
  0x13   :  { %s1071_s19 = smov [#allocation5]   ;;  %s1018_s23 = scalar_lea.hbm %s1274_s4, 3072 }
  0x14   :  { %s39_s20 = sshll.u32 %s1071_s19, 4  ;;  %p1019_p8 = scmp.ne.s32.totalorder %s1274_s4, %s1018_s23  ;;  %s40_s20 = int_to_ptr.vmem [resolvable:$true] %s39_s20 }
  0x15   :  { %p1022_p9 = scmp.lt.u32.totalorder %s1018_s23, %s1274_s4 }
  0x17   :  { %p1024_p10 = pnand %p1022_p9, %p1019_p8 }
  0x19   :  { %1027 = shalt.err (!%p1024_p10)
}
  0x1a   :  { %s1028_s29 = scalar_lea.vmem %s40_s20, 3072  ;;  %p1033_p12 = scmp.lt.s32.totalorder %s40_s20, %s40_s20 }
  0x1b   :  { %p1029_p11 = scmp.ne.s32.totalorder %s40_s20, %s1028_s29  ;;  %p1034_p13 = scmp.lt.s32.totalorder %s1028_s29, %s1028_s29 }
  0x1d   :  { %p1035_p0 = por %p1034_p13, %p1033_p12 }
  0x1f   :  { %p1036_p1 = pnand %p1035_p0, %p1029_p11 }
  0x21   :  { %1039 = shalt.err (!%p1036_p1)
}
  0x22   :  { %45 = dma.hbm_to_vmem [thread:$0]  %s1274_s4, 3072, %s40_s20, [#allocation6], %s1069_s15, %s1069_s15, %s1070_s16  }
  0x23   :  { %1062 = dma.done.wait [#allocation3], 768  }
  0x24   :  { %1063 = vsyncadd [#allocation3], 4294966528 }
  0x25   :  { %1064 = dma.done.wait [#allocation6], 3072  }
  0x26   :  { %1065 = vsyncadd [#allocation6], 4294964224  ;;  %v1072_v0 = vmov 0   ;;  %v1073_v1 = vmov 0.0   ;;  %v59_v2 = vld [vmem:[%s1270_s0] sm:$0xff]  ;;  %vm1074_vm0 = vmmov 0   ;;  %v60_v13 = vlaneseq }
  0x27   :  { %911 = vset.pattern.permute.xlu0 %v1072_v0  ;;  %834 = vmatprep.subr.bf16.mxu0 %v1073_v1  ;;  %v912_v3 = vld [vmem:[%s1271_s1] sm:$0xff]   ;;  %v913_v4 = vld [vmem:[%s1271_s1 + $0x8] sm:$0xff]   ;;  %v914_v5 = vld [vmem:[%s1271_s1 + $0x10] sm:$0xff]   ;;  %v1075_v18 = vmov 1.0|1.0   ;;  %vm231_vm3 = vcmask 261120  }
  0x28   :  { %854 = vmatprep.subr.bf16.mxu1 %v1073_v1  ;;  %63 = vperm.xlu0 %911, %v59_v2   ;;  %v923_v6 = vld [vmem:[#allocation2 + $0x8] ss:$12 sps:$4 sm:$0xff]   ;;  %v915_v7 = vld [vmem:[%s1271_s1 + $0x18] sm:$0xff]   ;;  %v916_v8 = vld [vmem:[%s1271_s1 + $0x20] sm:$0xff]   ;;  %v61_v14 = vand.u32 127, %v60_v13  ;;  %v1203_v50 = vshrl.u32 %v60_v13, 7 }
  0x29   :  { %850 = vmatprep.mubr.msk.bf16.mxu0 %vm1074_vm0, %v1073_v1  ;;  %858 = vmatprep.mubr.msk.bf16.mxu1 %vm1074_vm0, %v1073_v1  ;;  %v917_v9 = vld [vmem:[%s1271_s1 + $0x28] sm:$0xff]   ;;  %v918_v10 = vld [vmem:[%s1271_s1 + $0x30] sm:$0xff]   ;;  %v919_v11 = vld [vmem:[%s1271_s1 + $0x38] sm:$0xff]   ;;  %s1076_s17 = smov [#allocation7]  }
  0x2a   :  { %835 = vmatpush3.bf16.msra.mxu0 %v912_v3  ;;  %855 = vmatpush3.bf16.msra.mxu1 %v923_v6  ;;  %v922_v12 = vld [vmem:[#allocation2 + $0x4] ss:$12 sps:$4 sm:$0xff]   ;;  %v920_v16 = vld [vmem:[#allocation2] ss:$12 sps:$4 sm:$0xff]   ;;  %v926_v17 = vld [vmem:[#allocation2 + $0x1c] ss:$12 sps:$4 sm:$0xff]  }
  0x2b   :  { %836 = vmatprep.subr.bf16.mxu0 %v1073_v1  ;;  %856 = vmatprep.subr.bf16.mxu1 %v1073_v1  ;;  %v924_v19 = vld [vmem:[#allocation2 + $0x18] ss:$12 sps:$4 sm:$0xff]   ;;  %v927_v20 = vld [vmem:[#allocation2 + $0x20] ss:$12 sps:$4 sm:$0xff]   ;;  %v928_v27 = vld [vmem:[#allocation5] ss:$12 sps:$4 sm:$0xff]  }
  0x2c   :  { %v930_v26 = vld [vmem:[#allocation5 + $0x4] ss:$12 sps:$4 sm:$0xff]   ;;  %v931_v28 = vld [vmem:[#allocation5 + $0x8] ss:$12 sps:$4 sm:$0xff]   ;;  %v935_v31 = vld [vmem:[#allocation5 + $0x20] ss:$12 sps:$4 sm:$0xff]  }
  0x2d   :  { %v934_v29 = vld [vmem:[#allocation5 + $0x1c] ss:$12 sps:$4 sm:$0xff]   ;;  %v932_v30 = vld [vmem:[#allocation5 + $0x18] ss:$12 sps:$4 sm:$0xff]   ;;  %v938_v32 = vld [vmem:[#allocation5 + $0x34] ss:$12 sps:$4 sm:$0xff]  }
  0x2e   :  { %837 = vmatpush3.bf16.msra.mxu0 %v913_v4  ;;  %857 = vmatpush3.bf16.msra.mxu1 %v927_v20  ;;  %v936_v33 = vld [vmem:[#allocation5 + $0x30] ss:$12 sps:$4 sm:$0xff]   ;;  %v939_v34 = vld [vmem:[#allocation5 + $0x38] ss:$12 sps:$4 sm:$0xff]   ;;  %v940_v36 = vld [vmem:[#allocation5 + $0x48] ss:$12 sps:$4 sm:$0xff]  }
  0x2f   :  { %838 = vmatprep.subr.bf16.mxu0 %v1073_v1  ;;  %510 = vmatprep.subr.bf16.mxu1 %v930_v26  ;;  %v942_v35 = vld [vmem:[#allocation5 + $0x4c] ss:$12 sps:$4 sm:$0xff]   ;;  %v943_v37 = vld [vmem:[#allocation5 + $0x50] ss:$12 sps:$4 sm:$0xff]   ;;  %v947_v40 = vld [vmem:[#allocation5 + $0x68] ss:$12 sps:$4 sm:$0xff]  }
  0x30   :  { %v946_v38 = vld [vmem:[#allocation5 + $0x64] ss:$12 sps:$4 sm:$0xff]   ;;  %v944_v39 = vld [vmem:[#allocation5 + $0x60] ss:$12 sps:$4 sm:$0xff]   ;;  %v950_v41 = vld [vmem:[#allocation5 + $0x7c] ss:$12 sps:$4 sm:$0xff]  }
  0x31   :  { %v948_v42 = vld [vmem:[#allocation5 + $0x78] ss:$12 sps:$4 sm:$0xff]   ;;  %v951_v43 = vld [vmem:[#allocation5 + $0x80] ss:$12 sps:$4 sm:$0xff]   ;;  %v952_v45 = vld [vmem:[#allocation5 + $0x90] ss:$12 sps:$4 sm:$0xff]  }
  0x32   :  { %839 = vmatpush3.bf16.msra.mxu0 %v914_v5  ;;  %v954_v44 = vld [vmem:[#allocation5 + $0x94] ss:$12 sps:$4 sm:$0xff]   ;;  %v955_v46 = vld [vmem:[#allocation5 + $0x98] ss:$12 sps:$4 sm:$0xff]   ;;  %v959_v49 = vld [vmem:[#allocation5 + $0xb0] ss:$12 sps:$4 sm:$0xff]  }
  0x33   :  { %840 = vmatprep.subr.bf16.mxu0 %v1073_v1  ;;  %v958_v47 = vld [vmem:[#allocation5 + $0xac] ss:$12 sps:$4 sm:$0xff]   ;;  %v956_v48 = vld [vmem:[#allocation5 + $0xa8] ss:$12 sps:$4 sm:$0xff]   ;;  %v186_v51 = vsub.s32 0, %v1203_v50  ;;  %v194_v54 = vsub.s32 2, %v1203_v50 }
  0x34   :  { %v182_v52 = vld [vmem:[%s1273_s3] sm:$0x7]  ;;  %v190_v4 = vsub.s32 1, %v1203_v50  ;;  %v961_v20 = vld [vmem:[%s1276_s6 + $0x8] sm:$0xff]   ;;  %v967_v26 = vld [vmem:[%s1276_s6 + $0x38] sm:$0xff]   ;;  %s738_s18 = sshll.u32 %s1076_s17, 4  ;;  %s739_s18 = int_to_ptr.vmem [resolvable:$true] %s738_s18 }
  0x35   :  { %v187_v53 = vrot.slane %v182_v52, %v186_v51  ;;  %v195_v58 = vrot.slane %v182_v52, %v194_v54  ;;  %p1045_p3 = scmp.lt.s32.totalorder %s739_s18, %s739_s18 }
  0x36   :  { %841 = vmatpush3.bf16.msra.mxu0 %v915_v7  ;;  %v191_v6 = vrot.slane %v182_v52, %v190_v4 }
  0x37   :  { %842 = vmatprep.subr.bf16.mxu0 %v1073_v1 }
  0x3a   :  { %843 = vmatpush3.bf16.msra.mxu0 %v916_v8 }
  0x3b   :  { %844 = vmatprep.subr.bf16.mxu0 %v1073_v1 }
  0x3e   :  { %845 = vmatpush3.bf16.msra.mxu0 %v917_v9 }
  0x3f   :  { %846 = vmatprep.subr.bf16.mxu0 %v1073_v1 }
  0x42   :  { %847 = vmatpush3.bf16.msra.mxu0 %v918_v10 }
  0x43   :  { %848 = vmatprep.subr.bf16.mxu0 %v1073_v1 }
  0x46   :  { %849 = vmatpush3.bf16.msra.mxu0 %v919_v11 }
  0x47   :  { %235 = vmatprep.subr.bf16.mxu0 %v922_v12 }
  0xa7   :  { %v64_v15 = vpop.permute.xlu0 %63 }
  0xa8   :  { %vm65_vm1 = vcmp.eq.s32.totalorder %v61_v14, %v64_v15 }
  0xa9   :  { %vm757_vm2 = vmpackc.low %vm65_vm1, %vm65_vm1 }
  0xaa   :  { %851 = vmatmul.mubr.msk.bf16.vlgmr.msra.gmra.mrb[0].mxu0 %vm757_vm2, %v1075_v18 }
  0xab   :  { %236 = vmatpush1.bf16.msra.mxu0 %v920_v16  ;;  %267 = vmatprep.mubr.bf16.mxu0 %v1072_v0 }
  0xac   :  { %237 = vmatprep.subr.bf16.mxu0 %v926_v17 }
  0xaf   :  { %238 = vmatpush1.bf16.msra.mxu0 %v924_v19  ;;  %v960_v19 = vld [vmem:[%s1276_s6] sm:$0xff]  }
  0xb0   :  { %862 = vmatprep.subr.bf16.mxu0 %v1073_v1 }
 0x17d   :  { %v167_v21 = vpop.f32.mrb[0].mxu0 }
 0x17e   :  { %v173_v22 = vpack.c.bf16 %v167_v21, %v167_v21  ;;  %v852_v23 = vpop.f32.mrb[1].mxu0  ;;  %v962_v21 = vld [vmem:[%s1276_s6 + $0x10] sm:$0xff]  }
 0x17f   :  { %v170_v24 = vpop.f32.mrb[2].mxu0  ;;  %v964_v23 = vld [vmem:[%s1276_s6 + $0x20] sm:$0xff]  }
 0x180   :  { %v853_v25 = vpop.f32.mrb[3].mxu0  ;;  %765 = vmatmul.mubr.msk.bf16.vlgmr.msra.gmra.mrb[4].mxu0 %vm231_vm3, %v173_v22  ;;  %859 = vmatmul.mubr.msk.bf16.vlgmr.msra.gmra.mrb[0].mxu1 %vm231_vm3, %v173_v22  ;;  %v963_v22 = vld [vmem:[%s1276_s6 + $0x18] sm:$0xff]   ;;  %v965_v24 = vld [vmem:[%s1276_s6 + $0x28] sm:$0xff]  }
 0x181   :  { %542 = vmatprep.mubr.bf16.mxu1 %v1072_v0  ;;  %878 = vmatprep.mubr.msk.bf16.mxu0 %vm1074_vm0, %v1073_v1  ;;  %v966_v25 = vld [vmem:[%s1276_s6 + $0x30] sm:$0xff]  }
 0x182   :  { %511 = vmatpush1.bf16.msra.mxu1 %v928_v27  ;;  %863 = vmatpush3.bf16.msra.mxu0 %v931_v28  ;;  %v365_v27 = vld [vmem:[%s1275_s5] sm:$0x7] }
 0x183   :  { %864 = vmatprep.subr.bf16.mxu0 %v1073_v1  ;;  %512 = vmatprep.subr.bf16.mxu1 %v934_v29  ;;  %v370_v28 = vrot.slane %v365_v27, %v186_v51 }
 0x186   :  { %513 = vmatpush1.bf16.msra.mxu1 %v932_v30  ;;  %865 = vmatpush3.bf16.msra.mxu0 %v935_v31 }
 0x187   :  { %866 = vmatprep.subr.bf16.mxu0 %v1073_v1  ;;  %514 = vmatprep.subr.bf16.mxu1 %v938_v32  ;;  %v378_v32 = vrot.slane %v365_v27, %v194_v54  ;;  %v795_v54 = vld [vmem:[%s1277_s7] ss:$0 sm:$0xff]  ;;  %s1040_s7 = scalar_lea.vmem %s739_s18, 128 }
 0x188   :  { %p1041_p2 = scmp.ne.s32.totalorder %s739_s18, %s1040_s7  ;;  %p1046_p4 = scmp.lt.s32.totalorder %s1040_s7, %s1040_s7 }
 0x18a   :  { %515 = vmatpush1.bf16.msra.mxu1 %v936_v33  ;;  %867 = vmatpush3.bf16.msra.mxu0 %v939_v34  ;;  %p1047_p5 = por %p1046_p4, %p1045_p3 }
 0x18b   :  { %868 = vmatprep.subr.bf16.mxu0 %v1073_v1  ;;  %516 = vmatprep.subr.bf16.mxu1 %v942_v35 }
 0x18c   :  { %p1048_p6 = pnand %p1047_p5, %p1041_p2 }
 0x18e   :  { %517 = vmatpush1.bf16.msra.mxu1 %v940_v36  ;;  %869 = vmatpush3.bf16.msra.mxu0 %v943_v37 }
 0x18f   :  { %870 = vmatprep.subr.bf16.mxu0 %v1073_v1  ;;  %518 = vmatprep.subr.bf16.mxu1 %v946_v38 }
 0x192   :  { %519 = vmatpush1.bf16.msra.mxu1 %v944_v39  ;;  %871 = vmatpush3.bf16.msra.mxu0 %v947_v40 }
 0x193   :  { %520 = vmatprep.subr.bf16.mxu1 %v950_v41  ;;  %872 = vmatprep.subr.bf16.mxu0 %v1073_v1  ;;  %v374_v41 = vrot.slane %v365_v27, %v190_v4 }
 0x196   :  { %521 = vmatpush1.bf16.msra.mxu1 %v948_v42  ;;  %873 = vmatpush3.bf16.msra.mxu0 %v951_v43 }
 0x197   :  { %522 = vmatprep.subr.bf16.mxu1 %v954_v44  ;;  %874 = vmatprep.subr.bf16.mxu0 %v1073_v1 }
 0x19a   :  { %523 = vmatpush1.bf16.msra.mxu1 %v952_v45  ;;  %875 = vmatpush3.bf16.msra.mxu0 %v955_v46 }
 0x19b   :  { %524 = vmatprep.subr.bf16.mxu1 %v958_v47  ;;  %876 = vmatprep.subr.bf16.mxu0 %v1073_v1 }
 0x19e   :  { %525 = vmatpush1.bf16.msra.mxu1 %v956_v48  ;;  %877 = vmatpush3.bf16.msra.mxu0 %v959_v49 }
 0x19f   :  { %882 = vmatprep.subr.bf16.mxu1 %v1073_v1 }
 0x253   :  { %v269_v55 = vpop.f32.mrb[4].mxu0  ;;  %v310_v56 = vpop.f32.mrb[0].mxu1 }
 0x254   :  { %v270_v57 = vadd.f32 %v269_v55, %v187_v53  ;;  %v271_v59 = vpop.f32.mrb[5].mxu0  ;;  %v860_v60 = vpop.f32.mrb[1].mxu1  ;;  %v311_v3 = vadd.f32 %v310_v56, %v195_v58 }
 0x255   :  { %v273_v61 = vpop.f32.mrb[6].mxu0  ;;  %v313_v62 = vpop.f32.mrb[2].mxu1  ;;  %v272_v7 = vadd.f32 %v271_v59, %v191_v6 }
 0x256   :  { %v767_v63 = vmul.f32 -1.442695, %v270_v57  ;;  %v274_v0 = vpop.f32.mrb[7].mxu0  ;;  %v861_v2 = vpop.f32.mrb[3].mxu1  ;;  %v768_v5 = vmul.f32 -1.442695, %v311_v3 }
 0x258   :  { %968 = vpow2.f32 %v767_v63 }
 0x259   :  { %970 = vpow2.f32 %v768_v5 }
 0x25a   :  { %972 = vtanh.f32 %v272_v7 }
 0x262   :  { %v969_v8 = vpop.eup %968 }
 0x263   :  { %v319_v9 = vadd.f32 1.0, %v969_v8  ;;  %v971_v10 = vpop.eup %970 }
 0x264   :  { %v326_v11 = vadd.f32 1.0, %v971_v10  ;;  %v973_v12 = vpop.eup %972 }
 0x265   :  { %974 = vrcp.f32 %v319_v9 }
 0x266   :  { %976 = vrcp.f32 %v326_v11 }
 0x26f   :  { %v975_v13 = vpop.eup %974 }
 0x270   :  { %v329_v14 = vmul.f32 %v975_v13, %v973_v12  ;;  %v977_v15 = vpop.eup %976 }
 0x272   :  { %978 = vtanh.f32 %v329_v14 }
 0x27c   :  { %v979_v16 = vpop.eup %978 }
 0x27d   :  { %v331_v17 = vmul.f32 %v979_v16, %v977_v15 }
 0x27f   :  { %v332_v18 = vpack.c.bf16 %v331_v17, %v331_v17 }
 0x281   :  { %543 = vmatmul.mubr.bf16.vlgmr.msra.gmra.mrb[4].mxu1 %v332_v18  ;;  %879 = vmatmul.mubr.bf16.vlgmr.msra.gmra.mrb[8].mxu0 %v332_v18 }
 0x282   :  { %898 = vmatprep.mubr.msk.bf16.mxu1 %vm1074_vm0, %v1073_v1  ;;  %883 = vmatpush3.bf16.msra.mxu1 %v960_v19 }
 0x283   :  { %884 = vmatprep.subr.bf16.mxu1 %v1073_v1 }
 0x286   :  { %885 = vmatpush3.bf16.msra.mxu1 %v961_v20 }
 0x287   :  { %886 = vmatprep.subr.bf16.mxu1 %v1073_v1 }
 0x28a   :  { %887 = vmatpush3.bf16.msra.mxu1 %v962_v21 }
 0x28b   :  { %888 = vmatprep.subr.bf16.mxu1 %v1073_v1 }
 0x28e   :  { %889 = vmatpush3.bf16.msra.mxu1 %v963_v22 }
 0x28f   :  { %890 = vmatprep.subr.bf16.mxu1 %v1073_v1 }
 0x292   :  { %891 = vmatpush3.bf16.msra.mxu1 %v964_v23 }
 0x293   :  { %892 = vmatprep.subr.bf16.mxu1 %v1073_v1 }
 0x296   :  { %893 = vmatpush3.bf16.msra.mxu1 %v965_v24 }
 0x297   :  { %894 = vmatprep.subr.bf16.mxu1 %v1073_v1 }
 0x29a   :  { %895 = vmatpush3.bf16.msra.mxu1 %v966_v25 }
 0x29b   :  { %896 = vmatprep.subr.bf16.mxu1 %v1073_v1 }
 0x29e   :  { %897 = vmatpush3.bf16.msra.mxu1 %v967_v26 }
 0x354   :  { %v544_v29 = vpop.f32.mrb[4].mxu1  ;;  %v585_v30 = vpop.f32.mrb[8].mxu0 }
 0x355   :  { %v545_v31 = vadd.f32 %v544_v29, %v370_v28  ;;  %v546_v33 = vpop.f32.mrb[5].mxu1  ;;  %v880_v34 = vpop.f32.mrb[9].mxu0  ;;  %v586_v39 = vadd.f32 %v585_v30, %v378_v32 }
 0x356   :  { %v548_v35 = vpop.f32.mrb[6].mxu1  ;;  %v588_v36 = vpop.f32.mrb[10].mxu0  ;;  %v547_v42 = vadd.f32 %v546_v33, %v374_v41 }
 0x357   :  { %v793_v37 = vmul.f32 -1.442695, %v545_v31  ;;  %v549_v1 = vpop.f32.mrb[7].mxu1  ;;  %v881_v38 = vpop.f32.mrb[11].mxu0  ;;  %v794_v40 = vmul.f32 -1.442695, %v586_v39 }
 0x359   :  { %980 = vpow2.f32 %v793_v37 }
 0x35a   :  { %982 = vpow2.f32 %v794_v40 }
 0x35b   :  { %984 = vtanh.f32 %v547_v42 }
 0x363   :  { %v981_v43 = vpop.eup %980 }
 0x364   :  { %v594_v44 = vadd.f32 1.0, %v981_v43  ;;  %v983_v45 = vpop.eup %982 }
 0x365   :  { %v601_v46 = vadd.f32 1.0, %v983_v45  ;;  %v985_v47 = vpop.eup %984 }
 0x366   :  { %986 = vrcp.f32 %v594_v44 }
 0x367   :  { %988 = vrcp.f32 %v601_v46 }
 0x370   :  { %v987_v48 = vpop.eup %986 }
 0x371   :  { %v604_v49 = vmul.f32 %v987_v48, %v985_v47  ;;  %v989_v50 = vpop.eup %988 }
 0x373   :  { %990 = vtanh.f32 %v604_v49 }
 0x37d   :  { %v991_v51 = vpop.eup %990 }
 0x37e   :  { %v606_v52 = vmul.f32 %v991_v51, %v989_v50 }
 0x380   :  { %v607_v53 = vpack.c.bf16 %v606_v52, %v606_v52 }
 0x382   :  { %899 = vmatmul.mubr.bf16.vlgmr.msra.gmra.mrb[8].mxu1 %v607_v53 }
 0x455   :  { %v713_v55 = vpop.f32.mrb[8].mxu1 }
 0x456   :  { %v714_v56 = vadd.f32 %v795_v54, %v713_v55  ;;  %v900_v57 = vpop.f32.mrb[9].mxu1 }
 0x457   :  { %v716_v58 = vpop.f32.mrb[10].mxu1 }
 0x458   :  { %v719_v59 = vmax.f32 %v714_v56, 0.0  ;;  %v901_v60 = vpop.f32.mrb[11].mxu1 }
 0x45a   :  { %720 = vmax.xlane.f32.xlu0 %v719_v59 }
 0x4e7   :  { %v721_v61 = vpop.xlane.xlu0 %720 }
 0x4e8   :  { %v722_v62 = vsub.f32 %v719_v59, %v721_v61 }
 0x4ea   :  { %v723_v63 = vmul.f32 1.442695, %v722_v62 }
 0x4ec   :  { %992 = vpow2.f32 %v723_v63 }
 0x4f6   :  { %v993_v0 = vpop.eup %992 }
 0x4f7   :  { %725 = vadd.xlane.f32.xlu1 %v993_v0 }
 0x584   :  { %v726_v2 = vpop.xlane.xlu1 %725 }
 0x585   :  { %994 = vlog2.f32 %v726_v2 }
 0x58f   :  { %v995_v3 = vpop.eup %994 }
 0x590   :  { %v728_v4 = vmul.f32 0.6931472, %v995_v3 }
 0x592   :  { %v729_v5 = vadd.f32 %v728_v4, %v721_v61 }
 0x594   :  { %v730_v6 = vsub.f32 %v719_v59, %v729_v5 }
 0x596   :  { %731 = vst [vmem:[#allocation7] sm:$0xff] %v730_v6 }
 0x597   :  { %1051 = shalt.err (!%p1048_p6)
}
 0x598   :  { %s1052_s21 = scalar_lea.hbm %s1278_s8, 128 }
 0x599   :  { %p1053_p7 = scmp.ne.s32.totalorder %s1278_s8, %s1052_s21  ;;  %p1056_p8 = scmp.lt.u32.totalorder %s1052_s21, %s1278_s8 }
 0x59b   :  { %p1058_p9 = pnand %p1056_p8, %p1053_p7 }
 0x59d   :  { %1061 = shalt.err (!%p1058_p9)
}
 0x59e   :  { %741 = dma.vmem_to_hbm [thread:$0]  %s739_s18, 128, %s1278_s8, [#allocation4]  }
 0x59f   :  { %1066 = dma.done.wait [#allocation4], 128  }
 0x5a0   :  { %1067 = vsyncadd [#allocation4], 4294967168 }
 0x5a1   :  { %745 = vsyncpa [#allocation3], 1 }
 0x5a2   :  { %746 = vsyncpa [#allocation6], 1 }
 0x5a3   :  { %747 = vsyncpa [#allocation4], 1 }

</bundles_post_ra>
